<compile_context>
chip_gen: v7x
topology: tpu7x:2x2x1
jax: 0.10.0
libtpu: 0.0.40
codegen_flags: <defaults>
</compile_context>

<pallas_src>
import functools
import itertools

import jax
import jax.numpy as jnp
from jax.experimental import pallas as pl
from jax.experimental.pallas import tpu as pltpu


def _round_up(v, m):
    return (v + m - 1) // m * m


def get_same_padding(kernel_size):
    assert kernel_size % 2 > 0, "kernel size should be odd number"
    return kernel_size // 2


@functools.lru_cache(maxsize=None)
def _vmem_limit_bytes():
    """Generation-aware scoped-VMEM limit: physical capacity minus headroom."""
    try:
        cap = int(pltpu.get_tpu_info().vmem_capacity_bytes)
    except Exception:  # query unavailable: stay under v7x's 64 MiB physical.
        return 48 * 1024 * 1024
    return max(32 * 1024 * 1024, cap - 16 * 1024 * 1024)


def _single_buffered_spec(block_shape, index_map):
    """Constant-index weight blocks are fetched once; single-buffer them to
    halve their VMEM footprint.  Fall back if pipeline_mode is unavailable."""
    try:
        return pl.BlockSpec(block_shape, index_map, pipeline_mode=pl.Buffered(1))
    except Exception:
        return pl.BlockSpec(block_shape, index_map)


def _m_chunks(total, max_chunk):
    """Static (start, size) chunks covering [0, total); sizes multiples of 128."""
    chunks, start = [], 0
    while start < total:
        size = min(max_chunk, total - start)
        chunks.append((start, size))
        start += size
    return tuple(chunks)


# --------------------- kernel_size == 1: pointwise GEMM ----------------------

def _pointwise_kernel(w_ref, x_ref, o_ref):
    # w_ref: (O_pad, C)   x_ref: (C, tm)   o_ref: (O_pad, tm)
    o_ref[...] = jnp.dot(
        w_ref[...], x_ref[...], preferred_element_type=jnp.float32
    ).astype(o_ref.dtype)


def _pointwise_conv(x, filters, *, stride, o_bucket):
    """1x1x1 conv as per-batch (O_pad, C) @ (C, D*H*W); no wrapper transposes."""
    if stride > 1:
        x = x[:, :, ::stride, ::stride, ::stride]
    n, c, d, h, w = x.shape
    o = filters.shape[0]
    o_pad = o_bucket
    m = d * h * w

    xm = x.reshape(n, c, m)                          # C-major already: free reshape
    wm = jnp.pad(filters.reshape(o, c), ((0, o_pad - o), (0, 0)))   # (O_pad, C)

    if m <= 4096:
        tm, m_pad = m, m                             # single tile, no HBM pad pass
    else:
        tm = 2048
        m_pad = _round_up(m, tm)
        xm = jnp.pad(xm, ((0, 0), (0, 0), (0, m_pad - m)))

    cost = pl.CostEstimate(
        flops=2 * n * m_pad * c * o_pad,
        transcendentals=0,
        bytes_accessed=4 * (n * c * m_pad + o_pad * c + n * o_pad * m_pad),
    )
    out = pl.pallas_call(
        _pointwise_kernel,
        out_shape=jax.ShapeDtypeStruct((n, o_pad, m_pad), x.dtype),
        grid=(n, m_pad // tm),
        in_specs=[
            _single_buffered_spec((o_pad, c), lambda i, j: (0, 0)),
            pl.BlockSpec((None, c, tm), lambda i, j: (i, 0, j)),
        ],
        out_specs=pl.BlockSpec((None, o_pad, tm), lambda i, j: (i, 0, j)),
        compiler_params=pltpu.CompilerParams(
            dimension_semantics=("parallel", "parallel"),
            vmem_limit_bytes=_vmem_limit_bytes(),
        ),
        cost_estimate=cost,
    )(wm, xm)

    return out[:, :o, :m].reshape(n, o, d, h, w)     # already NCDHW


# ------------------ kernel_size > 1: fused direct convolution ----------------

def _direct_conv_kernel(x_ref, w_ref, o_ref, patch_ref, *, taps_hw, dil, wp,
                        c8, chunks):
    """One (batch, out-depth, depth-tap) grid step.

    x_ref     : (C8, S_pad)         one padded depth slice, channel-major,
                                    (H, W) flattened with row stride wp
    w_ref     : (k, O_pad, k*k*C8)  all taps' weights (fetched once)
    o_ref     : (O_pad, M_out)      output block, resident across the kd axis
    patch_ref : (k*k*C8, TM)        scratch for the (kh, kw, c)-folded patch
    """
    kd = pl.program_id(2)
    w_kd = w_ref[kd]                                  # (O_pad, k*k*C8)

    for (m0, msz) in chunks:                          # static, unrolled
        # Build the K-folded patch: K = k^2 * C8 (vs. C8 before the redesign).
        for t, (kh, kw) in enumerate(taps_hw):
            shift = kh * dil * wp + kw * dil          # static flat tap offset
            patch_ref[pl.ds(t * c8, c8), pl.ds(0, msz)] = (
                x_ref[:, pl.ds(m0 + shift, msz)])

        contrib = jnp.dot(w_kd, patch_ref[:, pl.ds(0, msz)],
                          preferred_element_type=jnp.float32)

        @pl.when(kd == 0)
        def _(contrib=contrib, m0=m0, msz=msz):
            o_ref[:, pl.ds(m0, msz)] = contrib.astype(o_ref.dtype)

        @pl.when(kd > 0)
        def _(contrib=contrib, m0=m0, msz=msz):
            o_ref[:, pl.ds(m0, msz)] += contrib.astype(o_ref.dtype)


def _direct_conv(x, filters, *, kernel_size, stride, dilation, o_bucket):
    """3-D conv, 'same' padding p = k // 2, depth stride folded in-kernel.

    x       : (N, C, D, H, W)  float32
    filters : (O, C, k, k, k)
    returns NCDHW output with H/W still at stride-1 resolution (subsampled by
    the caller when stride > 1).
    """
    n, c, d, h, w = x.shape
    k, st, dil = kernel_size, stride, dilation
    o = filters.shape[0]
    o_pad = o_bucket

    p = get_same_padding(k)
    eff_k = dil * (k - 1) + 1
    dp, hp, wp = d + 2 * p, h + 2 * p, w + 2 * p
    do_n = (dp - eff_k) // st + 1                    # depth stride folded
    ho_n = hp - eff_k + 1                            # stride-1 rows
    wo_n = wp - eff_k + 1

    c8 = _round_up(c, 8)
    m_valid = ho_n * wp                              # padded-Wp flat output rows
    m_out = _round_up(m_valid, 128)                  # lane-dense stores
    shift_max = (k - 1) * dil * (wp + 1)
    s_pad = _round_up(max(hp * wp, m_out + shift_max), 128)

    # Input prep (no transpose): pad channels + spatial, flatten (H, W), pad
    # each depth slice to s_pad, fold depth into the minor axis so a BlockSpec
    # block of size s_pad selects exactly one padded depth slice.
    xp = jnp.pad(x, ((0, 0), (0, c8 - c), (p, p), (p, p), (p, p)))
    xp = xp.reshape(n, c8, dp, hp * wp)
    if s_pad > hp * wp:
        xp = jnp.pad(xp, ((0, 0), (0, 0), (0, 0), (0, s_pad - hp * wp)))
    x_flat = xp.reshape(n, c8, dp * s_pad)

    # Weights: (O, C, kd, kh, kw) -> (kd, O_pad, kh*kw*C8), zero-padded.
    wt = jnp.transpose(filters, (2, 0, 3, 4, 1))
    wt = jnp.pad(wt, ((0, 0), (0, o_pad - o), (0, 0), (0, 0), (0, c8 - c)))
    w_flat = wt.reshape(k, o_pad, k * k * c8)

    chunks = _m_chunks(m_out, 512)
    tm_max = max(sz for _, sz in chunks)
    taps_hw = tuple(itertools.product(range(k), range(k)))
    kernel = functools.partial(_direct_conv_kernel, taps_hw=taps_hw, dil=dil,
                               wp=wp, c8=c8, chunks=chunks)

    cost = pl.CostEstimate(
        flops=2 * n * do_n * k * o_pad * (k * k * c8) * m_out,
        transcendentals=0,
        bytes_accessed=4 * (n * do_n * k * c8 * s_pad
                            + k * o_pad * k * k * c8
                            + n * do_n * o_pad * m_out),
    )

    out = pl.pallas_call(
        kernel,
        out_shape=jax.ShapeDtypeStruct((n, o_pad, do_n * m_out), x.dtype),
        grid=(n, do_n, k),
        in_specs=[
            # One padded depth slice per step: depth index = do*stride + kd*dil.
            pl.BlockSpec((None, c8, s_pad),
                         lambda i, j, t: (i, 0, j * st + t * dil)),
            # All taps' weights, constant index -> fetched once, single buffer.
            _single_buffered_spec((k, o_pad, k * k * c8),
                                  lambda i, j, t: (0, 0, 0)),
        ],
        # Output block constant across the kd axis -> in-VMEM accumulator.
        out_specs=pl.BlockSpec((None, o_pad, m_out), lambda i, j, t: (i, 0, j)),
        scratch_shapes=[pltpu.VMEM((k * k * c8, tm_max), jnp.float32)],
        compiler_params=pltpu.CompilerParams(
            dimension_semantics=("parallel", "parallel", "arbitrary"),
            vmem_limit_bytes=_vmem_limit_bytes(),
        ),
        cost_estimate=cost,
    )(x_flat, w_flat)

    # Channel-major output: only slices + reshapes, no transpose.
    y = out.reshape(n, o_pad, do_n, m_out)
    y = y[:, :o, :, :m_valid].reshape(n, o, do_n, ho_n, wp)[..., :wo_n]
    return y


# --------------------------------- module ------------------------------------

class DynamicConv2d:
    """JAX/Pallas port of the PyTorch DynamicConv2d (dynamic-channel Conv3d)."""

    def __init__(self, max_in_channels, max_out_channels, kernel_size=1,
                 stride=1, dilation=1, *, key=None):
        self.max_in_channels = max_in_channels
        self.max_out_channels = max_out_channels
        self.kernel_size = kernel_size
        self.stride = stride
        self.dilation = dilation
        self.active_out_channel = max_out_channels
        # Static lane-dense bucket: one compiled kernel shape for every
        # active_out_channel configuration (inactive columns are zero).
        # TODO(synk): bucket to 256 on v6e/v7x when max_out_channels >> 128.
        self.out_channel_bucket = _round_up(max_out_channels, 128)
        if key is None:
            key = jax.random.PRNGKey(0)
        fan_in = max_in_channels * kernel_size ** 3
        bound = 1.0 / (fan_in ** 0.5)
        self.weight = jax.random.uniform(
            key,
            (max_out_channels, max_in_channels,
             kernel_size, kernel_size, kernel_size),
            dtype=jnp.float32, minval=-bound, maxval=bound,
        )

    def get_active_filter(self, out_channel, in_channel):
        return self.weight[:out_channel, :in_channel]

    def __call__(self, x, out_channel=None):
        if out_channel is None:
            out_channel = self.active_out_channel
        in_channel = x.shape[1]
        filters = self.get_active_filter(out_channel, in_channel)

        if self.kernel_size == 1:
            return _pointwise_conv(x, filters, stride=self.stride,
                                   o_bucket=self.out_channel_bucket)

        y = _direct_conv(x, filters, kernel_size=self.kernel_size,
                         stride=self.stride, dilation=self.dilation,
                         o_bucket=self.out_channel_bucket)
        if self.stride > 1:
            # Depth stride is folded in-kernel; with "same" padding the strided
            # H/W output is the stride-1 output subsampled.
            # TODO(synk): fold H/W stride into the kernel via strided row gathers.
            y = y[:, :, :, ::self.stride, ::self.stride]
        return y                                        # NCDHW


# --------------------------------- checks ------------------------------------

def _conv3d_reference(x, filt, stride, padding, dilation):
    return jax.lax.conv_general_dilated(
        x, filt,
        window_strides=(stride,) * 3,
        padding=[(padding, padding)] * 3,
        rhs_dilation=(dilation,) * 3,
        dimension_numbers=("NCDHW", "OIDHW", "NCDHW"),
    )


if __name__ == "__main__":
    key = jax.random.PRNGKey(0)
    kx, kw1, kw2, kw3, kw4 = jax.random.split(key, 5)

    max_in, max_out = 8, 16
    batch, d, h, w = 2, 4, 8, 8
    x = jax.random.normal(kx, (batch, max_in, d, h, w), dtype=jnp.float32)

    # Case 1: kernel_size=1 (pointwise), dynamic out_channel=12.
    layer1 = DynamicConv2d(max_in, max_out, kernel_size=1, key=kw1)
    layer1.active_out_channel = 12
    y1 = jax.block_until_ready(layer1(x))
    ref1 = _conv3d_reference(x, layer1.get_active_filter(12, max_in),
                             stride=1, padding=0, dilation=1)
    assert y1.shape == ref1.shape, (y1.shape, ref1.shape)
    assert jnp.allclose(y1, ref1, atol=1e-4, rtol=1e-4)

    # Case 2: kernel_size=3, "same" padding, full out channels.
    layer2 = DynamicConv2d(max_in, max_out, kernel_size=3, key=kw2)
    y2 = jax.block_until_ready(layer2(x))
    ref2 = _conv3d_reference(x, layer2.get_active_filter(max_out, max_in),
                             stride=1, padding=1, dilation=1)
    assert y2.shape == ref2.shape, (y2.shape, ref2.shape)
    assert jnp.allclose(y2, ref2, atol=1e-4, rtol=1e-4)

    # Case 3: kernel_size=3, stride=2, dynamic out_channel=10.
    layer3 = DynamicConv2d(max_in, max_out, kernel_size=3, stride=2, key=kw3)
    layer3.active_out_channel = 10
    y3 = jax.block_until_ready(layer3(x))
    ref3 = _conv3d_reference(x, layer3.get_active_filter(10, max_in),
                             stride=2, padding=1, dilation=1)
    assert y3.shape == ref3.shape, (y3.shape, ref3.shape)
    assert jnp.allclose(y3, ref3, atol=1e-4, rtol=1e-4)

    # Case 4: kernel_size=3, dilation=2 (padding stays k//2, as in the module).
    layer4 = DynamicConv2d(max_in, max_out, kernel_size=3, dilation=2, key=kw4)
    y4 = jax.block_until_ready(layer4(x))
    ref4 = _conv3d_reference(x, layer4.get_active_filter(max_out, max_in),
                             stride=1, padding=1, dilation=2)
    assert y4.shape == ref4.shape, (y4.shape, ref4.shape)
    assert jnp.allclose(y4, ref4, atol=1e-4, rtol=1e-4)

    print("KERNEL_OK")
</pallas_src>

<mosaic_0001>
module attributes {stable_mosaic.version = 11 : i64} {
  func.func @_pointwise_kernel(%arg0: i32, %arg1: i32, %arg2: memref<128x8xf32, #tpu.memory_space<vmem>>, %arg3: memref<1x8x256xf32, #tpu.memory_space<vmem>>, %arg4: memref<1x128x256xf32, #tpu.memory_space<vmem>>) attributes {dimension_semantics = [#tpu.dimension_semantics<parallel>, #tpu.dimension_semantics<parallel>], iteration_bounds = array<i64: 2, 1>, scalar_prefetch = 0 : i64, scratch_operands = 0 : i64, tpu.core_type = #tpu.core_type<tc>, window_params = [{pipeline_mode = #tpu.pipeline_mode<synchronous>, transform_indices = @transform_0, window_bounds = array<i64: 128, 8>}, {transform_indices = @transform_1, window_bounds = array<i64: 1, 8, 256>}, {transform_indices = @transform_2, window_bounds = array<i64: 1, 128, 256>}]} {
    %c0 = arith.constant 0 : index
    %c0_0 = arith.constant 0 : index
    %0 = vector.load %arg2[%c0, %c0_0] : memref<128x8xf32, #tpu.memory_space<vmem>>, vector<128x8xf32>
    %c0_1 = arith.constant 0 : index
    %c0_2 = arith.constant 0 : index
    %c0_3 = arith.constant 0 : index
    %1 = vector.load %arg3[%c0_1, %c0_2, %c0_3] : memref<1x8x256xf32, #tpu.memory_space<vmem>>, vector<1x8x256xf32>
    %2 = vector.shape_cast %1 : vector<1x8x256xf32> to vector<8x256xf32>
    %cst = arith.constant dense<0.000000e+00> : vector<128x256xf32>
    %3 = tpu.matmul %0, %2, %cst {dimension_numbers = #tpu.dot_dimension_numbers<[1], [0], [0], [1], [0, 0, 1, 1], [], []>} : vector<128x8xf32>, vector<8x256xf32>, vector<128x256xf32> -> vector<128x256xf32>
    %c0_4 = arith.constant 0 : index
    %c0_5 = arith.constant 0 : index
    %c0_6 = arith.constant 0 : index
    %4 = vector.load %arg4[%c0_4, %c0_5, %c0_6] : memref<1x128x256xf32, #tpu.memory_space<vmem>>, vector<1x128x256xf32>
    %5 = vector.shape_cast %4 : vector<1x128x256xf32> to vector<128x256xf32>
    %6 = vector.shape_cast %3 : vector<128x256xf32> to vector<1x128x256xf32>
    tpu.vector_store %arg4[%c0_4, %c0_5, %c0_6], %6 {strides = array<i32>} : memref<1x128x256xf32, #tpu.memory_space<vmem>>, vector<1x128x256xf32>,
    return
  }
  func.func @transform_0(%arg0: i32, %arg1: i32) -> (i32, i32) {
    %c0_i32 = arith.constant 0 : i32
    %c0_i32_0 = arith.constant 0 : i32
    %c0_i32_1 = arith.constant 0 : i32
    return %c0_i32, %c0_i32_0 : i32, i32
  }
  func.func @transform_1(%arg0: i32, %arg1: i32) -> (i32, i32, i32) {
    %c0_i32 = arith.constant 0 : i32
    %c0_i32_0 = arith.constant 0 : i32
    return %arg0, %c0_i32, %arg1 : i32, i32, i32
  }
  func.func @transform_2(%arg0: i32, %arg1: i32) -> (i32, i32, i32) {
    %c0_i32 = arith.constant 0 : i32
    %c0_i32_0 = arith.constant 0 : i32
    return %arg0, %c0_i32, %arg1 : i32, i32, i32
  }
}

</mosaic_0001>

<bundles_post_ra>
// kernel: tpu_custom_call.1
= control target key start
LH: loop header
LB: loop body
LE: loop exit
PB: predicated region body
PF: predicated region fallthrough
CT: control target
= control target key end

     0   :  { %7 = vsyncpa [#allocation3], 0  ;;  %s936_s0 = inlined_call_operand.vmem [shape: f32[128,8], index: 0, kind: input, shape index: {}]   ;;  %s937_s1 = inlined_call_operand.vmem [shape: f32[2,8,256], index: 1, kind: input, shape index: {}]   ;;  %s938_s2 = inlined_call_operand.hbm [shape: f32[2,128,256], index: 2, kind: output, shape index: {}]  }
   0x1   :  { %9 = vsyncpa [#allocation3 + $0x1], 0  ;;  %s718_s9 = smov 0   ;;  %s720_s10 = smov 0  }
   0x2   :  { %s722_s11 = smov 0   ;;  %s724_s12 = smov 0  }
   0x3   :  { %s726_s13 = smov 0   ;;  %s728_s14 = smov 0  }
   0x4 LB: > { %s528_s15 = sadd.s32 4294967295, %s697_s14   ;;  %s529_s16 = sadd.s32 4294967294, %s697_s14   ;;  %s697_s14 = sphi %s728_s14, %s15_s14   ;;  %s693_s13 = sphi %s726_s13, %s945_s13   ;;  %s689_s12 = sphi %s724_s12, %s944_s12   ;;  %s685_s11 = sphi %s722_s11, %s943_s11   ;;  %s681_s10 = sphi %s720_s10, %s942_s10   ;;  %s677_s9 = sphi %s718_s9, %s941_s9  }
   0x5   : > { %s27_s17 = sadd.s32 1, %s693_s13  ;;  %s85_s18 = sadd.s32 1, %s685_s11 }
   0x6   : > { %p29_p0 = scmp.ge.s32.totalorder %s27_s17, 2  ;;  %p95_p1 = scmp.ne.s32.totalorder %s685_s11, %s681_s10 }
   0x7   : > { %p96_p2 = scmp.eq.s32.totalorder %s528_s15, 1  ;;  %p101_p3 = scmp.ne.s32.totalorder %s681_s10, %s677_s9 }
   0x8   : > { %s947_s17 = smov (%p29_p0, %s27_s17), 0  ;;  %p102_p5 = scmp.eq.s32.totalorder %s529_s16, 1 }
   0x9   : > { %p758_p4 = por %p96_p2, %p95_p1  ;;  %s80_s20 = ssub.s32 %s693_s13, %s947_s17 }
   0xa   : > { %p532_p6 = scmp.ge.s32.totalorder %s697_s14, 1  ;;  %p83_p7 = scmp.eq.s32.totalorder %s80_s20, 0 }
   0xb   : > { %p765_p8 = por %p102_p5, %p101_p3  ;;  %p136_p9 = scmp.lt.s32.totalorder %s697_s14, 3 }
   0xc   : > { %s771_s22 = scalar_select %p83_p7, %s685_s11, %s85_s18  }
   0xd   : > { %p137_p10 = pnand %p532_p6, %p136_p9 }
   0xe   : > { %p163_p11 = scmp.lt.s32.totalorder (!%p137_p10), %s689_s12, 1  ;;  %v699_v0 = vmov (!%p137_p10), 0.0   ;;  %v173_v1 = vld [vmem:[%s936_s0] sm:$0xff] (!%p137_p10)  ;;  %vm191_vm0 = vcmask (!%p137_p10), 64512   ;;  %v174_v5 = vld [vmem:[%s936_s0 + $0x8] sm:$0xff] (!%p137_p10)  ;;  %v175_v7 = vld [vmem:[%s936_s0 + $0x10] sm:$0xff] (!%p137_p10) }
   0xf   : > { %140 = sbr.rel (%p137_p10) target bundleno = 285 (0x11d), region = 28  ;;  %304 = vmatprep.mubr.f32.mxu0 (!%p137_p10), %v699_v0  ;;  %352 = vmatprep.mubr.f32.mxu1 (!%p137_p10), %v699_v0  ;;  %v181_v4 = vld [vmem:[%s936_s0 + $0x40] sm:$0xff] (!%p137_p10)  ;;  %v182_v6 = vld [vmem:[%s936_s0 + $0x48] sm:$0xff] (!%p137_p10)  ;;  %v183_v8 = vld [vmem:[%s936_s0 + $0x50] sm:$0xff] (!%p137_p10)  ;;  %s700_s5 = smov (!%p137_p10), [#allocation2]  }
  0x10   : > { %v176_v9 = vld [vmem:[%s936_s0 + $0x18] sm:$0xff] (!%p137_p10)  ;;  %v177_v11 = vld [vmem:[%s936_s0 + $0x20] sm:$0xff] (!%p137_p10)  ;;  %v178_v13 = vld [vmem:[%s936_s0 + $0x28] sm:$0xff] (!%p137_p10)  ;;  %s623_s6 = sshll.u32 (!%p137_p10), %s700_s5, 4  ;;  %s624_s6 = int_to_ptr.vmem [resolvable:$false] %s623_s6 }
  0x11   : > { %v184_v10 = vld [vmem:[%s936_s0 + $0x58] sm:$0xff] (!%p137_p10)  ;;  %v185_v12 = vld [vmem:[%s936_s0 + $0x60] sm:$0xff] (!%p137_p10)  ;;  %v186_v14 = vld [vmem:[%s936_s0 + $0x68] sm:$0xff] (!%p137_p10)  ;;  %s625_s7 = scalar_lea.vmem (!%p137_p10), %s624_s6, 8192 }
  0x12   : > { %v179_v15 = vld [vmem:[%s936_s0 + $0x30] sm:$0xff] (!%p137_p10)  ;;  %v180_v17 = vld [vmem:[%s936_s0 + $0x38] sm:$0xff] (!%p137_p10) }
  0x13   : > { %v187_v16 = vld [vmem:[%s936_s0 + $0x70] sm:$0xff] (!%p137_p10)  ;;  %v188_v18 = vld [vmem:[%s936_s0 + $0x78] sm:$0xff] (!%p137_p10) }
  0x16   : > { %s164_s23 = scalar_select %p163_p11, %s689_s12, 1 }
  0x18   : > { %s557_s24 = sshll.u32 %s164_s23, 4 }
  0x19   : > { %s170_s27 = scalar_lea.vmem %s937_s1, %s557_s24  ;;  %s159_s24 = sand.u32 1, %s681_s10  }
  0x1a   : > { %v190_v2 = vld [vmem:[%s170_s27 + $0x8] sm:$0xff]  ;;  %v189_v3 = vld [vmem:[%s170_s27] sm:$0xff]  ;;  %s533_s25 = sshll.u32 %s159_s24, 8  ;;  %s558_s27 = sshll.u32 %s689_s12, 12 }
  0x1b   : > { %240 = vmatprep.subr.mxu0 %v190_v2  ;;  %559 = vmatprep.subr.mxu1 %v190_v2  ;;  %s845_s26 = scalar_lea.vmem [#allocation2], %s533_s25  ;;  %s880_s3 = scalar_lea.hbm %s938_s2, %s558_s27 }
  0x1c   : > { %241 = vmatpush1.msra.mxu0 %v189_v3  ;;  %560 = vmatpush1.msra.mxu1 %v189_v3  ;;  %s449_s28 = sshll.u32 %s845_s26, 4  ;;  %s890_s12 = scalar_lea.sflag [#allocation3], %s159_s24  ;;  %s882_s28 = int_to_ptr.vmem [resolvable:$true] %s449_s28 }
  0x1d   : > { %536 = vmatmul.mubr.msk.f32.vlgmr.msra.gmra.mrb[0].mxu0 %vm191_vm0, %v173_v1  ;;  %544 = vmatmul.mubr.msk.f32.vlgmr.msra.gmra.mrb[0].mxu1 %vm191_vm0, %v181_v4  ;;  %s619_s4 = scalar_lea.vmem %s882_s28, 4096  ;;  %p626_p1 = scmp.lt.s32.totalorder %s882_s28, %s624_s6 }
  0x1e   : > { %310 = vmatprep.mubr.f32.mxu0 %v699_v0  ;;  %358 = vmatprep.mubr.f32.mxu1 %v699_v0  ;;  %p620_p12 = scmp.ne.s32.totalorder %s882_s28, %s619_s4  ;;  %p627_p2 = scmp.lt.s32.totalorder %s625_s7, %s619_s4 }
  0x20   : > { %p621_p13 = pnand %p620_p12, %p758_p4  ;;  %p628_p3 = por %p627_p2, %p626_p1 }
  0x21   : > { %537 = vmatmul.mubr.msk.f32.gmra.mrb[2].mxu0 %vm191_vm0, %v174_v5  ;;  %545 = vmatmul.mubr.msk.f32.gmra.mrb[2].mxu1 %vm191_vm0, %v182_v6 }
  0x22   : > { %316 = vmatprep.mubr.f32.mxu0 %v699_v0  ;;  %364 = vmatprep.mubr.f32.mxu1 %v699_v0  ;;  %p622_p0 = pneg %p621_p13 }
  0x24   : > { %p629_p5 = pnand %p628_p3, %p622_p0 }
  0x25   : > { %538 = vmatmul.mubr.msk.f32.gmra.mrb[4].mxu0 %vm191_vm0, %v175_v7  ;;  %546 = vmatmul.mubr.msk.f32.gmra.mrb[4].mxu1 %vm191_vm0, %v183_v8 }
  0x26   : > { %322 = vmatprep.mubr.f32.mxu0 %v699_v0  ;;  %370 = vmatprep.mubr.f32.mxu1 %v699_v0 }
  0x29   : > { %539 = vmatmul.mubr.msk.f32.gmra.mrb[6].mxu0 %vm191_vm0, %v176_v9  ;;  %547 = vmatmul.mubr.msk.f32.gmra.mrb[6].mxu1 %vm191_vm0, %v184_v10 }
  0x2a   : > { %328 = vmatprep.mubr.f32.mxu0 %v699_v0  ;;  %376 = vmatprep.mubr.f32.mxu1 %v699_v0 }
  0x2d   : > { %540 = vmatmul.mubr.msk.f32.gmra.mrb[8].mxu0 %vm191_vm0, %v177_v11  ;;  %548 = vmatmul.mubr.msk.f32.gmra.mrb[8].mxu1 %vm191_vm0, %v185_v12 }
  0x2e   : > { %334 = vmatprep.mubr.f32.mxu0 %v699_v0  ;;  %382 = vmatprep.mubr.f32.mxu1 %v699_v0 }
  0x31   : > { %541 = vmatmul.mubr.msk.f32.gmra.mrb[10].mxu0 %vm191_vm0, %v178_v13  ;;  %549 = vmatmul.mubr.msk.f32.gmra.mrb[10].mxu1 %vm191_vm0, %v186_v14 }
  0x32   : > { %340 = vmatprep.mubr.f32.mxu0 %v699_v0  ;;  %388 = vmatprep.mubr.f32.mxu1 %v699_v0 }
  0x35   : > { %542 = vmatmul.mubr.msk.f32.gmra.mrb[12].mxu0 %vm191_vm0, %v179_v15  ;;  %550 = vmatmul.mubr.msk.f32.gmra.mrb[12].mxu1 %vm191_vm0, %v187_v16 }
  0x36   : > { %346 = vmatprep.mubr.f32.mxu0 %v699_v0  ;;  %394 = vmatprep.mubr.f32.mxu1 %v699_v0 }
  0x39   : > { %543 = vmatmul.mubr.msk.f32.gmra.mrb[14].mxu0 %vm191_vm0, %v180_v17  ;;  %551 = vmatmul.mubr.msk.f32.gmra.mrb[14].mxu1 %vm191_vm0, %v188_v18 }
  0xf0   : > { %v306_v19 = vpop.f32.mrb[0].mxu0  ;;  %v354_v20 = vpop.f32.mrb[0].mxu1 }
  0xf1   : > { %401 = vst [vmem:[%s845_s26] sm:$0xff] %v306_v19  ;;  %417 = vst [vmem:[%s845_s26 + $0x80] sm:$0xff] %v354_v20  ;;  %v308_v21 = vpop.f32.mrb[1].mxu0  ;;  %v356_v22 = vpop.f32.mrb[1].mxu1 }
  0xf2   : > { %402 = vst [vmem:[%s845_s26 + $0x8] sm:$0xff] %v308_v21  ;;  %418 = vst [vmem:[%s845_s26 + $0x88] sm:$0xff] %v356_v22 }
  0xf4   : > { %v312_v23 = vpop.f32.mrb[2].mxu0  ;;  %v360_v24 = vpop.f32.mrb[2].mxu1 }
  0xf5   : > { %403 = vst [vmem:[%s845_s26 + $0x10] sm:$0xff] %v312_v23  ;;  %419 = vst [vmem:[%s845_s26 + $0x90] sm:$0xff] %v360_v24  ;;  %v314_v25 = vpop.f32.mrb[3].mxu0  ;;  %v362_v26 = vpop.f32.mrb[3].mxu1 }
  0xf6   : > { %404 = vst [vmem:[%s845_s26 + $0x18] sm:$0xff] %v314_v25  ;;  %420 = vst [vmem:[%s845_s26 + $0x98] sm:$0xff] %v362_v26 }
  0xf8   : > { %v318_v27 = vpop.f32.mrb[4].mxu0  ;;  %v366_v28 = vpop.f32.mrb[4].mxu1 }
  0xf9   : > { %405 = vst [vmem:[%s845_s26 + $0x20] sm:$0xff] %v318_v27  ;;  %421 = vst [vmem:[%s845_s26 + $0xa0] sm:$0xff] %v366_v28  ;;  %v320_v29 = vpop.f32.mrb[5].mxu0  ;;  %v368_v30 = vpop.f32.mrb[5].mxu1 }
  0xfa   : > { %406 = vst [vmem:[%s845_s26 + $0x28] sm:$0xff] %v320_v29  ;;  %422 = vst [vmem:[%s845_s26 + $0xa8] sm:$0xff] %v368_v30 }
  0xfc   : > { %v324_v31 = vpop.f32.mrb[6].mxu0  ;;  %v372_v32 = vpop.f32.mrb[6].mxu1 }
  0xfd   : > { %407 = vst [vmem:[%s845_s26 + $0x30] sm:$0xff] %v324_v31  ;;  %423 = vst [vmem:[%s845_s26 + $0xb0] sm:$0xff] %v372_v32  ;;  %v326_v33 = vpop.f32.mrb[7].mxu0  ;;  %v374_v34 = vpop.f32.mrb[7].mxu1 }
  0xfe   : > { %408 = vst [vmem:[%s845_s26 + $0x38] sm:$0xff] %v326_v33  ;;  %424 = vst [vmem:[%s845_s26 + $0xb8] sm:$0xff] %v374_v34 }
 0x100   : > { %v330_v35 = vpop.f32.mrb[8].mxu0  ;;  %v378_v36 = vpop.f32.mrb[8].mxu1 }
 0x101   : > { %409 = vst [vmem:[%s845_s26 + $0x40] sm:$0xff] %v330_v35  ;;  %425 = vst [vmem:[%s845_s26 + $0xc0] sm:$0xff] %v378_v36  ;;  %v332_v37 = vpop.f32.mrb[9].mxu0  ;;  %v380_v38 = vpop.f32.mrb[9].mxu1 }
 0x102   : > { %410 = vst [vmem:[%s845_s26 + $0x48] sm:$0xff] %v332_v37  ;;  %426 = vst [vmem:[%s845_s26 + $0xc8] sm:$0xff] %v380_v38 }
 0x104   : > { %v336_v39 = vpop.f32.mrb[10].mxu0  ;;  %v384_v40 = vpop.f32.mrb[10].mxu1 }
 0x105   : > { %411 = vst [vmem:[%s845_s26 + $0x50] sm:$0xff] %v336_v39  ;;  %427 = vst [vmem:[%s845_s26 + $0xd0] sm:$0xff] %v384_v40  ;;  %v338_v41 = vpop.f32.mrb[11].mxu0  ;;  %v386_v42 = vpop.f32.mrb[11].mxu1 }
 0x106   : > { %412 = vst [vmem:[%s845_s26 + $0x58] sm:$0xff] %v338_v41  ;;  %428 = vst [vmem:[%s845_s26 + $0xd8] sm:$0xff] %v386_v42 }
 0x108   : > { %v342_v43 = vpop.f32.mrb[12].mxu0  ;;  %v390_v44 = vpop.f32.mrb[12].mxu1 }
 0x109   : > { %413 = vst [vmem:[%s845_s26 + $0x60] sm:$0xff] %v342_v43  ;;  %429 = vst [vmem:[%s845_s26 + $0xe0] sm:$0xff] %v390_v44  ;;  %v344_v45 = vpop.f32.mrb[13].mxu0  ;;  %v392_v46 = vpop.f32.mrb[13].mxu1 }
 0x10a   : > { %414 = vst [vmem:[%s845_s26 + $0x68] sm:$0xff] %v344_v45  ;;  %430 = vst [vmem:[%s845_s26 + $0xe8] sm:$0xff] %v392_v46 }
 0x10c   : > { %v348_v47 = vpop.f32.mrb[14].mxu0  ;;  %v396_v48 = vpop.f32.mrb[14].mxu1 }
 0x10d   : > { %415 = vst [vmem:[%s845_s26 + $0x70] sm:$0xff] %v348_v47  ;;  %431 = vst [vmem:[%s845_s26 + $0xf0] sm:$0xff] %v396_v48  ;;  %v350_v49 = vpop.f32.mrb[15].mxu0  ;;  %v398_v50 = vpop.f32.mrb[15].mxu1 }
 0x10e   : > { %416 = vst [vmem:[%s845_s26 + $0x78] sm:$0xff] %v350_v49  ;;  %432 = vst [vmem:[%s845_s26 + $0xf8] sm:$0xff] %v398_v50 }
 0x10f   : > { %632 = shalt.err (!%p629_p5)
}
 0x110   : > { %s633_s8 = scalar_lea.hbm %s880_s3, 4096  ;;  %s637_s18 = scalar_lea.hbm %s938_s2, 8192 }
 0x111   : > { %p634_p6 = scmp.ne.s32.totalorder %s880_s3, %s633_s8  ;;  %p638_p10 = scmp.lt.u32.totalorder %s880_s3, %s938_s2 }
 0x112   : > { %p639_p11 = scmp.lt.u32.totalorder %s637_s18, %s633_s8  ;;  %p641_p13 = scmp.lt.u32.totalorder %s633_s8, %s880_s3 }
 0x113   : > { %p635_p7 = pnand %p634_p6, %p758_p4 }
 0x114   : > { %p640_p12 = por %p639_p11, %p638_p10 }
 0x115   : > { %p636_p9 = pneg %p635_p7 }
 0x116   : > { %p642_p0 = por %p641_p13, %p640_p12 }
 0x118   : > { %p643_p1 = pnand %p642_p0, %p636_p9 }
 0x11a   : > { %646 = shalt.err (!%p643_p1)
}
 0x11b   : > { %s701_s24 = smov 256   ;;  %s702_s25 = smov 16  }
 0x11c   : > { %561 = dma.vmem_to_hbm [thread:$0]  (%p758_p4), %s882_s28, 4096, %s880_s3, %s890_s12, %s701_s24, %s701_s24, %s702_s25  }
 0x11d PF: > { %p567_p2 = scmp.ge.s32.totalorder %s697_s14, 2  ;;  %s464_s26 = sand.u32 1, %s677_s9  }
 0x11e   : > { %s465_s27 = scalar_lea.sflag [#allocation3], %s464_s26 }
 0x11f   : > { %p564_p3 = pnand %p567_p2, %p765_p8 }
 0x121   : > { %672 = dma.done.wait (!%p564_p3), %s465_s27, 4096  }
 0x122   : > { %674 = vsyncadd (!%p564_p3), %s465_s27, 4294963200  ;;  %s15_s14 = sadd.s32 1, %s697_s14   ;;  %s941_s9 = smov %s681_s10 }
 0x123   : > { %p12_p5 = scmp.ge.s32.totalorder %s15_s14, 4   ;;  %s942_s10 = smov %s685_s11 }
 0x124   : > { %s943_s11 = smov %s771_s22  ;;  %s944_s12 = smov %s693_s13 }
 0x125   : > { %s945_s13 = smov %s947_s17  ;;  %14 = sbr.rel (!%p12_p5) target bundleno = 4 (0x4), region = 63 }
 0x12c   :  { %470 = vsyncpa [#allocation3], 1 }
 0x12d   :  { %472 = vsyncpa [#allocation3 + $0x1], 1 }

</bundles_post_ra>
